<compile_context>
chip_gen: v5e
topology: v5e:2x2
jax: 0.10.0
libtpu: 0.0.40
codegen_flags: <defaults>
</compile_context>

<pallas_src>
import jax
import jax.numpy as jnp
from jax.experimental import pallas as pl
from jax.experimental.pallas import tpu as pltpu


def _round_up(n, m):
    return ((n + m - 1) // m) * m


# ---------------------------------------------------------------------------
# Parameter packing (host side, done once):
#   weights buffer (weight_dtype, default bf16), rows 16-aligned per section:
#     rows [r1, r1+S)   : w1                 (S , F1)
#     rows [r2, r2+F1)  : w2                 (F1, F2)
#     rows [r3, r3+F2)  : [wv | wa | 0-pad]  (F2, width)   <- fused heads
#   biases buffer (f32, 8 x width):
#     row 0 : b1   row 1 : b2   row 2 : [bv | ba | 0-pad]
# ---------------------------------------------------------------------------
def pack_qnetwork_params(params, weight_dtype=jnp.bfloat16):
    w1, b1 = params["w1"], params["b1"]
    w2, b2 = params["w2"], params["b2"]
    wa, ba = params["wa"], params["ba"]
    wv, bv = params["wv"], params["bv"]

    S, F1 = w1.shape
    F2 = w2.shape[1]
    A = wa.shape[1]

    width = max(F1, F2, A + 1)
    sec1 = _round_up(S, 16)
    sec2 = _round_up(F1, 16)
    sec3 = _round_up(F2, 16)
    r1, r2, r3 = 0, sec1, sec1 + sec2
    rows = sec1 + sec2 + sec3

    wbuf = jnp.zeros((rows, width), weight_dtype)
    wbuf = wbuf.at[r1:r1 + S, :F1].set(w1.astype(weight_dtype))
    wbuf = wbuf.at[r2:r2 + F1, :F2].set(w2.astype(weight_dtype))
    # fused heads: column 0 = state-value head, columns 1..A = advantage head
    wbuf = wbuf.at[r3:r3 + F2, 0].set(wv[:, 0].astype(weight_dtype))
    wbuf = wbuf.at[r3:r3 + F2, 1:1 + A].set(wa.astype(weight_dtype))

    bbuf = jnp.zeros((8, width), jnp.float32)
    bbuf = bbuf.at[0, :F1].set(b1.reshape(F1).astype(jnp.float32))
    bbuf = bbuf.at[1, :F2].set(b2.reshape(F2).astype(jnp.float32))
    bbuf = bbuf.at[2, 0].set(bv.reshape(-1)[0].astype(jnp.float32))
    bbuf = bbuf.at[2, 1:1 + A].set(ba.reshape(A).astype(jnp.float32))

    meta = dict(S=S, F1=F1, F2=F2, A=A, r1=r1, r2=r2, r3=r3,
                rows=rows, width=width)
    return wbuf, bbuf, meta


def _make_qnetwork_kernel(meta, compute_dtype):
    S, F1, F2, A = meta["S"], meta["F1"], meta["F2"], meta["A"]
    r1, r2, r3 = meta["r1"], meta["r2"], meta["r3"]
    cd = compute_dtype

    def kernel(x_ref, w_ref, b_ref, out_ref):
        # Weights are already stored in the compute dtype -> slice, no casts.
        x = x_ref[...].astype(cd)                           # (Bt, S)

        # fc1 + relu  (MXU in compute dtype, f32 accumulate, f32 epilogue)
        h1 = jnp.dot(x, w_ref[r1:r1 + S, :F1],
                     preferred_element_type=jnp.float32) + b_ref[0:1, :F1]
        h1 = jnp.maximum(h1, 0.0)                           # (Bt, F1) f32

        # fc2 + relu
        h2 = jnp.dot(h1.astype(cd), w_ref[r2:r2 + F1, :F2],
                     preferred_element_type=jnp.float32) + b_ref[1:2, :F2]
        h2 = jnp.maximum(h2, 0.0)                           # (Bt, F2) f32

        # fused value+advantage heads in a single MXU pass; ReLU on both heads
        head = jnp.dot(h2.astype(cd), w_ref[r3:r3 + F2, :],
                       preferred_element_type=jnp.float32) + b_ref[2:3, :]
        head = jnp.maximum(head, 0.0)                       # (Bt, width) f32

        v = head[:, 0:1]                                    # (Bt, 1)
        adv = head[:, 1:1 + A]                              # (Bt, A)
        adv_mean = jnp.mean(adv, axis=1, keepdims=True)     # (Bt, 1)

        out_ref[...] = (v + adv - adv_mean).astype(out_ref.dtype)

    return kernel


def _pick_batch_tile(B, block_b):
    """Batch tile: big tiles amortize per-step overhead; guarantee >=2 grid
    steps for non-tiny batches so v7x's 2 TensorCores both get work."""
    if B <= 16:
        return B                       # single tiny block (valid: equals full dim)
    half = _round_up(-(-B // 2), 8)    # ceil(B/2) rounded up to sublane multiple
    bt = min(max(8, (block_b // 8) * 8), half)
    return bt


def qnetwork_forward(state, wbuf, bbuf, meta, *,
                     block_b=8192, vmem_limit_bytes=32 << 20):
    """state: (B, state_size) f32. wbuf/bbuf/meta from pack_qnetwork_params.

    block_b=8192 keeps total VMEM (double-buffered state/out blocks + three
    (bt,64) f32 intermediates + narrow-dtype operand copies, ~1.5 KB/row) well
    under v7x's 32 MiB scoped budget; on v5e/v6e (128 MiB VMEM) it is safe to
    raise block_b to ~32768 together with vmem_limit_bytes.
    """
    B, S = state.shape
    A = meta["A"]
    F1, F2, width = meta["F1"], meta["F2"], meta["width"]
    compute_dtype = wbuf.dtype

    bt = _pick_batch_tile(B, block_b)
    grid = (pl.cdiv(B, bt),)

    kernel = _make_qnetwork_kernel(meta, compute_dtype)

    flops = 2 * B * (S * F1 + F1 * F2 + F2 * width)
    bytes_accessed = (B * S * 4 + B * A * 4
                      + wbuf.size * wbuf.dtype.itemsize
                      + bbuf.size * bbuf.dtype.itemsize)

    return pl.pallas_call(
        kernel,
        out_shape=jax.ShapeDtypeStruct((B, A), jnp.float32),
        grid=grid,
        in_specs=[
            pl.BlockSpec((bt, S), lambda i: (i, 0)),        # state: batch-tiled
            pl.BlockSpec(wbuf.shape, lambda i: (0, 0)),     # weights: VMEM-resident
            pl.BlockSpec(bbuf.shape, lambda i: (0, 0)),     # biases:  VMEM-resident
        ],
        out_specs=pl.BlockSpec((bt, A), lambda i: (i, 0)),
        compiler_params=pltpu.CompilerParams(
            dimension_semantics=("parallel",),   # batch axis -> megacore on v7x
            vmem_limit_bytes=vmem_limit_bytes,
        ),
        cost_estimate=pl.CostEstimate(
            flops=flops, transcendentals=0, bytes_accessed=bytes_accessed),
    )(state, wbuf, bbuf)


# ---------------------------------------------------------------------------
# Deterministic init (PyTorch nn.Linear style) and pure-JAX reference.
# ---------------------------------------------------------------------------
def init_params(key, state_size, action_size, fc1_units=64, fc2_units=64):
    ks = jax.random.split(key, 8)

    def lin(kw, kb, fan_in, fan_out):
        bound = 1.0 / jnp.sqrt(jnp.float32(fan_in))
        w = jax.random.uniform(kw, (fan_in, fan_out), jnp.float32, -bound, bound)
        b = jax.random.uniform(kb, (1, fan_out), jnp.float32, -bound, bound)
        return w, b

    w1, b1 = lin(ks[0], ks[1], state_size, fc1_units)
    w2, b2 = lin(ks[2], ks[3], fc1_units, fc2_units)
    wa, ba = lin(ks[4], ks[5], fc2_units, action_size)
    wv, bv = lin(ks[6], ks[7], fc2_units, 1)
    return dict(w1=w1, b1=b1, w2=w2, b2=b2, wa=wa, ba=ba, wv=wv, bv=bv)


def qnetwork_reference(state, p):
    """Matches the PyTorch forward exactly (ReLU applied to V and adv)."""
    h1 = jax.nn.relu(state @ p["w1"] + p["b1"])
    h2 = jax.nn.relu(h1 @ p["w2"] + p["b2"])
    v = jax.nn.relu(h2 @ p["wv"] + p["bv"])
    adv = jax.nn.relu(h2 @ p["wa"] + p["ba"])
    return v + adv - jnp.mean(adv, axis=1, keepdims=True)


if __name__ == "__main__":
    key = jax.random.PRNGKey(0)
    k_param, k_state, k_state2 = jax.random.split(key, 3)

    state_size = 8
    action_size = 4

    params = init_params(k_param, state_size, action_size)

    # Production path: weights packed in bf16 (f32 accumulation in-kernel).
    wbuf_bf16, bbuf, meta = pack_qnetwork_params(params, weight_dtype=jnp.bfloat16)
    # Validation-only path: weights packed in f32 (bit-close to the reference).
    wbuf_f32, _, _ = pack_qnetwork_params(params, weight_dtype=jnp.float32)

    # --- small batch, single grid step -------------------------------------
    state = jax.random.normal(k_state, (2, state_size), jnp.float32)
    q_ref = qnetwork_reference(state, params)

    q_f32 = qnetwork_forward(state, wbuf_f32, bbuf, meta)
    q_f32 = jax.block_until_ready(q_f32)
    assert q_f32.shape == (2, action_size)
    assert jnp.allclose(q_f32, q_ref, atol=1e-5, rtol=1e-5), (q_f32, q_ref)

    q_bf16 = qnetwork_forward(state, wbuf_bf16, bbuf, meta)
    q_bf16 = jax.block_until_ready(q_bf16)
    assert jnp.allclose(q_bf16, q_ref, atol=3e-2, rtol=3e-2), (q_bf16, q_ref)

    # --- larger batch exercising the multi-step batch grid (partial block) --
    state2 = jax.random.normal(k_state2, (20, state_size), jnp.float32)
    q2 = qnetwork_forward(state2, wbuf_f32, bbuf, meta, block_b=8)
    q2 = jax.block_until_ready(q2)
    q2_ref = qnetwork_reference(state2, params)
    assert q2.shape == (20, action_size)
    assert jnp.allclose(q2, q2_ref, atol=1e-5, rtol=1e-5), (q2, q2_ref)

    print("KERNEL_OK")
</pallas_src>

<mosaic_0001>
module attributes {stable_mosaic.version = 11 : i64} {
  func.func @kernel(%arg0: i32, %arg1: memref<2x8xf32, #tpu.memory_space<vmem>>, %arg2: memref<144x64xf32, #tpu.memory_space<vmem>>, %arg3: memref<8x64xf32, #tpu.memory_space<vmem>>, %arg4: memref<2x4xf32, #tpu.memory_space<vmem>>) attributes {dimension_semantics = [#tpu.dimension_semantics<parallel>], iteration_bounds = array<i64: 1>, scalar_prefetch = 0 : i64, scratch_operands = 0 : i64, tpu.core_type = #tpu.core_type<tc>, window_params = [{transform_indices = @transform_0, window_bounds = array<i64: 2, 8>}, {pipeline_mode = #tpu.pipeline_mode<synchronous>, transform_indices = @transform_1, window_bounds = array<i64: 144, 64>}, {pipeline_mode = #tpu.pipeline_mode<synchronous>, transform_indices = @transform_2, window_bounds = array<i64: 8, 64>}, {transform_indices = @transform_3, window_bounds = array<i64: 2, 4>}]} {
    %c0 = arith.constant 0 : index
    %c0_0 = arith.constant 0 : index
    %0 = vector.load %arg1[%c0, %c0_0] : memref<2x8xf32, #tpu.memory_space<vmem>>, vector<2x8xf32>
    %c0_1 = arith.constant 0 : index
    %c0_2 = arith.constant 0 : index
    %1 = vector.load %arg2[%c0_1, %c0_2] : memref<144x64xf32, #tpu.memory_space<vmem>>, vector<8x64xf32>
    %cst = arith.constant dense<0.000000e+00> : vector<2x64xf32>
    %2 = tpu.matmul %0, %1, %cst {dimension_numbers = #tpu.dot_dimension_numbers<[1], [0], [0], [1], [0, 0, 1, 1], [], []>} : vector<2x8xf32>, vector<8x64xf32>, vector<2x64xf32> -> vector<2x64xf32>
    %c0_3 = arith.constant 0 : index
    %c0_4 = arith.constant 0 : index
    %3 = vector.load %arg3[%c0_3, %c0_4] : memref<8x64xf32, #tpu.memory_space<vmem>>, vector<1x64xf32>
    %4 = vector.broadcast %3 : vector<1x64xf32> to vector<2x64xf32>
    %5 = arith.addf %2, %4 : vector<2x64xf32>
    %cst_5 = arith.constant 0.000000e+00 : f32
    %6 = vector.broadcast %cst_5 : f32 to vector<2x64xf32>
    %7 = arith.maximumf %5, %6 : vector<2x64xf32>
    %c16 = arith.constant 16 : index
    %c0_6 = arith.constant 0 : index
    %8 = vector.load %arg2[%c16, %c0_6] : memref<144x64xf32, #tpu.memory_space<vmem>>, vector<64x64xf32>
    %cst_7 = arith.constant dense<0.000000e+00> : vector<2x64xf32>
    %9 = tpu.matmul %7, %8, %cst_7 {dimension_numbers = #tpu.dot_dimension_numbers<[1], [0], [0], [1], [0, 0, 1, 1], [], []>} : vector<2x64xf32>, vector<64x64xf32>, vector<2x64xf32> -> vector<2x64xf32>
    %c1 = arith.constant 1 : index
    %c0_8 = arith.constant 0 : index
    %10 = vector.load %arg3[%c1, %c0_8] : memref<8x64xf32, #tpu.memory_space<vmem>>, vector<1x64xf32>
    %11 = vector.broadcast %10 : vector<1x64xf32> to vector<2x64xf32>
    %12 = arith.addf %9, %11 : vector<2x64xf32>
    %cst_9 = arith.constant 0.000000e+00 : f32
    %13 = vector.broadcast %cst_9 : f32 to vector<2x64xf32>
    %14 = arith.maximumf %12, %13 : vector<2x64xf32>
    %c80 = arith.constant 80 : index
    %c0_10 = arith.constant 0 : index
    %15 = vector.load %arg2[%c80, %c0_10] : memref<144x64xf32, #tpu.memory_space<vmem>>, vector<64x64xf32>
    %cst_11 = arith.constant dense<0.000000e+00> : vector<2x64xf32>
    %16 = tpu.matmul %14, %15, %cst_11 {dimension_numbers = #tpu.dot_dimension_numbers<[1], [0], [0], [1], [0, 0, 1, 1], [], []>} : vector<2x64xf32>, vector<64x64xf32>, vector<2x64xf32> -> vector<2x64xf32>
    %c2 = arith.constant 2 : index
    %c0_12 = arith.constant 0 : index
    %17 = vector.load %arg3[%c2, %c0_12] : memref<8x64xf32, #tpu.memory_space<vmem>>, vector<1x64xf32>
    %18 = vector.broadcast %17 : vector<1x64xf32> to vector<2x64xf32>
    %19 = arith.addf %16, %18 : vector<2x64xf32>
    %cst_13 = arith.constant 0.000000e+00 : f32
    %20 = vector.broadcast %cst_13 : f32 to vector<2x64xf32>
    %21 = arith.maximumf %19, %20 : vector<2x64xf32>
    %22 = vector.extract_strided_slice %21 {offsets = [0, 0], sizes = [2, 1], strides = [1, 1]} : vector<2x64xf32> to vector<2x1xf32>
    %23 = vector.extract_strided_slice %21 {offsets = [0, 1], sizes = [2, 4], strides = [1, 1]} : vector<2x64xf32> to vector<2x4xf32>
    %cst_14 = arith.constant dense<0.000000e+00> : vector<2xf32>
    %24 = vector.multi_reduction <add>, %23, %cst_14 [1] : vector<2x4xf32> to vector<2xf32>
    %25 = vector.shape_cast %24 : vector<2xf32> to vector<2x1xf32>
    %cst_15 = arith.constant 4.000000e+00 : f32
    %26 = vector.broadcast %cst_15 : f32 to vector<2x1xf32>
    %27 = arith.divf %25, %26 : vector<2x1xf32>
    %28 = vector.broadcast %22 : vector<2x1xf32> to vector<2x4xf32>
    %29 = arith.addf %28, %23 : vector<2x4xf32>
    %30 = vector.broadcast %27 : vector<2x1xf32> to vector<2x4xf32>
    %31 = arith.subf %29, %30 : vector<2x4xf32>
    %c0_16 = arith.constant 0 : index
    %c0_17 = arith.constant 0 : index
    %32 = vector.load %arg4[%c0_16, %c0_17] : memref<2x4xf32, #tpu.memory_space<vmem>>, vector<2x4xf32>
    tpu.vector_store %arg4[%c0_16, %c0_17], %31 {strides = array<i32>} : memref<2x4xf32, #tpu.memory_space<vmem>>, vector<2x4xf32>,
    return
  }
  func.func @transform_0(%arg0: i32) -> (i32, i32) {
    %c0_i32 = arith.constant 0 : i32
    %c0_i32_0 = arith.constant 0 : i32
    return %arg0, %c0_i32 : i32, i32
  }
  func.func @transform_1(%arg0: i32) -> (i32, i32) {
    %c0_i32 = arith.constant 0 : i32
    %c0_i32_0 = arith.constant 0 : i32
    %c0_i32_1 = arith.constant 0 : i32
    return %c0_i32, %c0_i32_0 : i32, i32
  }
  func.func @transform_2(%arg0: i32) -> (i32, i32) {
    %c0_i32 = arith.constant 0 : i32
    %c0_i32_0 = arith.constant 0 : i32
    %c0_i32_1 = arith.constant 0 : i32
    return %c0_i32, %c0_i32_0 : i32, i32
  }
  func.func @transform_3(%arg0: i32) -> (i32, i32) {
    %c0_i32 = arith.constant 0 : i32
    %c0_i32_0 = arith.constant 0 : i32
    return %arg0, %c0_i32 : i32, i32
  }
}

</mosaic_0001>

<bundles_post_ra>
// kernel: tpu_custom_call.1
= control target key start
LH: loop header
LB: loop body
LE: loop exit
PB: predicated region body
PF: predicated region fallthrough
CT: control target
= control target key end

     0   :  { %vm19_vm0 = vcmask 64512   ;;  %s288_s0 = inlined_call_operand.vmem [shape: f32[2,8], index: 0, kind: input, shape index: {}]   ;;  %s289_s1 = inlined_call_operand.vmem [shape: f32[144,64], index: 1, kind: input, shape index: {}]   ;;  %s290_s2 = inlined_call_operand.vmem [shape: f32[8,64], index: 2, kind: input, shape index: {}]   ;;  %s291_s3 = inlined_call_operand.hbm [shape: f32[2,4], index: 3, kind: output, shape index: {}]  }
   0x1   :  { %v16_v0 = vld [vmem:[%s289_s1] sm:$0xff]  ;;  %v51_v2 = vld [vmem:[%s289_s1 + $0x48] sm:$0xff]  ;;  %v49_v4 = vld [vmem:[%s289_s1 + $0x38] sm:$0xff] }
   0x2   :  { %v15_v1 = vld [vmem:[%s288_s0] sm:$0x3]  ;;  %38 = vmatpush.msra.mxu0 %v16_v0  ;;  %66 = vmatpush.msra.mxu1 %v51_v2 }
   0x3   :  { %v50_v3 = vld [vmem:[%s289_s1 + $0x40] sm:$0xff]  ;;  %156 = vmatmul.msk.f32.vlgmr.msra.gmra.mxu0 %vm19_vm0, %v15_v1 }
   0x4   :  { %67 = vmatpush.msra.mxu1 %v50_v3 }
   0x5   :  { %8 = vsyncpa [#allocation3], 0  ;;  %v48_v5 = vld [vmem:[%s289_s1 + $0x30] sm:$0xff]  ;;  %v47_v6 = vld [vmem:[%s289_s1 + $0x28] sm:$0xff]  ;;  %vm54_vm1 = vcmask 523264   ;;  %v196_v26 = vmov 0  }
   0x6   :  { %68 = vmatpush.msra.mxu1 %v49_v4  ;;  %v46_v7 = vld [vmem:[%s289_s1 + $0x20] sm:$0xff]  ;;  %v45_v8 = vld [vmem:[%s289_s1 + $0x18] sm:$0xff]  ;;  %v44_v9 = vld [vmem:[%s289_s1 + $0x10] sm:$0xff]  ;;  %163 = vset.pattern.permute.xlu1 %v196_v26  ;;  %vm117_vm2 = vcmask 25600   ;;  %v198_v33 = vmov 4.0   ;;  %s147_s28 = sshll.u32 %s291_s3, 4  ;;  %s148_s28 = int_to_ptr.hbm [resolvable:$true] %s147_s28 }
   0x7   :  { %v86_v10 = vld [vmem:[%s289_s1 + $0x88] sm:$0xff]  ;;  %v85_v11 = vld [vmem:[%s289_s1 + $0x80] sm:$0xff]  ;;  %v84_v12 = vld [vmem:[%s289_s1 + $0x78] sm:$0xff]  ;;  %164 = vset.pattern.permute.xlu0 %v196_v26  ;;  %168 = vrcp.f32 %v198_v33 }
   0x8   :  { %69 = vmatpush.msra.mxu1 %v48_v5  ;;  %100 = vmatpush.msra.mxu2 %v86_v10  ;;  %v83_v13 = vld [vmem:[%s289_s1 + $0x70] sm:$0xff]  ;;  %v82_v14 = vld [vmem:[%s289_s1 + $0x68] sm:$0xff]  ;;  %v165_v15 = vld [vmem:[%s290_s2] ss:$0 sm:$0xff] }
   0x9   :  { %v81_v19 = vld [vmem:[%s289_s1 + $0x60] sm:$0xff]  ;;  %v80_v20 = vld [vmem:[%s289_s1 + $0x58] sm:$0xff]  ;;  %v79_v21 = vld [vmem:[%s289_s1 + $0x50] sm:$0xff]  ;;  %s197_s1 = smov 127  }
   0xa   :  { %70 = vmatpush.msra.mxu1 %v47_v6  ;;  %101 = vmatpush.msra.mxu2 %v85_v11  ;;  %v166_v22 = vld [vmem:[%s290_s2 + $0x1] ss:$0 sm:$0xff]  ;;  %v167_v27 = vld [vmem:[%s290_s2 + $0x2] ss:$0 sm:$0xff]  ;;  %s199_s2 = smov [#allocation2]  }
   0xb   :  { %s145_s25 = sshll.u32 %s199_s2, 4  ;;  %s146_s25 = int_to_ptr.vmem [resolvable:$true] %s145_s25 }
   0xc   :  { %71 = vmatpush.msra.mxu1 %v46_v7  ;;  %102 = vmatpush.msra.mxu2 %v84_v12 }
   0xd   :  { %v169_v34 = vpop.eup %168 }
   0xe   :  { %72 = vmatpush.msra.mxu1 %v45_v8  ;;  %103 = vmatpush.msra.mxu2 %v83_v13  ;;  %v122_v35 = vmul.f32 4.0, %v169_v34  ;;  %vm126_vm3 = vweird.f32 %v169_v34 }
  0x10   :  { %73 = vmatpush.msra.mxu1 %v44_v9  ;;  %104 = vmatpush.msra.mxu2 %v82_v14  ;;  %v123_v36 = vsub.f32 1.0, %v122_v35 }
  0x12   :  { %105 = vmatpush.msra.mxu2 %v81_v19  ;;  %v124_v37 = vmul.f32 %v169_v34, %v123_v36 }
  0x14   :  { %106 = vmatpush.msra.mxu2 %v80_v20  ;;  %v125_v38 = vadd.f32 %v169_v34, %v124_v37 }
  0x16   :  { %107 = vmatpush.msra.mxu2 %v79_v21  ;;  %v127_v40 = vsel %vm126_vm3, %v169_v34, %v125_v38 }
  0x80   :  { %v40_v16 = vpop.f32.mrf.mxu0 }
  0x81   :  { %v41_v17 = vadd.f32 %v165_v15, %v40_v16 }
  0x83   :  { %v43_v18 = vmax.f32 %v41_v17, 0.0 }
  0x85   :  { %157 = vmatmul.msk.f32.vlgmr.msra.gmra.mxu1 %vm54_vm1, %v43_v18 }
 0x102   :  { %v75_v23 = vpop.f32.mrf.mxu1 }
 0x103   :  { %v76_v24 = vadd.f32 %v166_v22, %v75_v23 }
 0x105   :  { %v78_v25 = vmax.f32 %v76_v24, 0.0 }
 0x107   :  { %158 = vmatmul.msk.f32.vlgmr.msra.gmra.mxu2 %vm54_vm1, %v78_v25 }
 0x18a   :  { %v109_v28 = vpop.f32.mrf.mxu2 }
 0x18b   :  { %v110_v29 = vadd.f32 %v167_v27, %v109_v28 }
 0x18d   :  { %v112_v30 = vmax.f32 %v110_v29, 0.0 }
 0x18f   :  { %130 = vperm.xlu1 %163, %v112_v30   ;;  %114 = vrot.lane.b32.xlu0 %v112_v30, %s197_s1 }
 0x201   :  { %v115_v31 = vpop.permute.xlu0 %114  ;;  %v131_v39 = vpop.permute.xlu1 %130 }
 0x202   :  { %v118_v32 = vsel %vm117_vm2, %v115_v31, 0.0  ;;  %v133_v42 = vadd.f32 %v131_v39, %v112_v30 }
 0x203   :  { %119 = vadd.xlane.f32.xlu0 %v118_v32 }
 0x276   :  { %v120_v41 = vpop.xlane.xlu0 %119 }
 0x277   :  { %v128_v43 = vmul.f32 %v127_v40, %v120_v41 }
 0x279   :  { %v134_v44 = vsub.f32 %v133_v42, %v128_v43 }
 0x27b   :  { %136 = vrot.lane.b32.xlu1 %v134_v44, %s197_s1 }
 0x2ed   :  { %v137_v45 = vpop.permute.xlu1 %136 }
 0x2ee   :  { %139 = vst.msk [vmem:[#allocation2] sm:$0x3] %vm117_vm2, %v137_v45 }
 0x2ef   :  { %150 = dma.vmem_to_hbm [thread:$0]  %s146_s25, 32, %s148_s28, [#allocation3]  }
 0x2f0   :  { %194 = dma.done.wait [#allocation3], 32  }
 0x2f1   :  { %195 = vsyncadd [#allocation3], 4294967264 }
 0x2f2   :  { %155 = vsyncpa [#allocation3], 1 }

</bundles_post_ra>
